<compile_context>
chip_gen: v7x
topology: tpu7x:2x2x1
jax: 0.10.0
libtpu: 0.0.40
codegen_flags: <defaults>
</compile_context>

<pallas_src>
import jax
import jax.numpy as jnp
from jax.experimental import pallas as pl
from jax.experimental.pallas import tpu as pltpu


def _round_up(x: int, m: int) -> int:
    return (x + m - 1) // m * m


def _temp_scale_kernel(temp_ref, x_ref, o_ref):
    # temp_ref: (1,) scalar in SMEM. Hoist the reciprocal onto the scalar path,
    # then one VPU multiply per vreg of the lane-dense tile.
    inv_t = 1.0 / temp_ref[0]
    o_ref[...] = (x_ref[...] * inv_t).astype(o_ref.dtype)


def temperature_scale(
    logits: jax.Array,
    temperature: jax.Array,
    *,
    block_rows: int = 512,
    lane: int = 512,
    tiny_threshold: int = 2048,
) -> jax.Array:
    """TemperatureScaling.forward: returns logits / temperature.

    logits: any-shaped float array (typically (N, C)).
    temperature: (1,) float array (the nn.Parameter).
    """
    assert temperature.shape == (1,)
    orig_shape = logits.shape
    total = logits.size

    # For genuinely tiny inputs the per-grid-step + launch overhead dominates;
    # a plain XLA divide is strictly faster.
    if total <= tiny_threshold:
        return logits / temperature

    # --- Lane-dense repacking (layout plumbing only; op is elementwise) ------
    lane = max(128, _round_up(lane, 128))      # last dim: multiple of 128
    rows = -(-total // lane)                   # ceil
    padded_total = rows * lane

    flat = logits.reshape(-1)
    if padded_total != total:
        # Zero padding (< lane elements): 0 * (1/t) = 0, no NaN propagation;
        # padded lanes are discarded by the final slice.
        flat = jnp.pad(flat, (0, padded_total - total))
    x2d = flat.reshape(rows, lane)

    if rows <= max(block_rows, 8):
        # Single block covering the full array (full-extent dims are always a
        # legal block shape, even if not (8,128)-aligned).
        block_rows_eff = rows
        grid = (1,)
    else:
        block_rows_eff = _round_up(min(block_rows, rows), 8)
        # Non-divisible grid is fine: Pallas masks the boundary block's
        # out-of-range stores, so no padding to a block multiple is needed.
        grid = (pl.cdiv(rows, block_rows_eff),)

    out2d = pl.pallas_call(
        _temp_scale_kernel,
        out_shape=jax.ShapeDtypeStruct((rows, lane), logits.dtype),
        grid_spec=pltpu.PrefetchScalarGridSpec(
            num_scalar_prefetch=0,
            grid=grid,
            in_specs=[
                pl.BlockSpec(memory_space=pltpu.SMEM),                     # temperature
                pl.BlockSpec((block_rows_eff, lane), lambda i: (i, 0)),    # logits tile
            ],
            out_specs=pl.BlockSpec((block_rows_eff, lane), lambda i: (i, 0)),
        ),
        compiler_params=pltpu.CompilerParams(
            # Independent row tiles -> shard across the 2 TensorCores on v7x.
            dimension_semantics=("parallel",),
        ),
    )(temperature, x2d)

    if padded_total == total:
        return out2d.reshape(orig_shape)
    return out2d.reshape(-1)[:total].reshape(orig_shape)


if __name__ == "__main__":
    key = jax.random.PRNGKey(0)
    k1, k2, k3, k4 = jax.random.split(key, 4)

    # nn.Parameter(torch.ones(1) * 1.0) -> use a non-trivial value for the check.
    temperature = jnp.ones((1,), dtype=jnp.float32) * 1.5

    # 1) Tiny CIFAR-10 style case (8, 10): takes the jnp fallback path.
    logits_tiny = jax.random.normal(k1, (8, 10), dtype=jnp.float32)
    out_tiny = jax.block_until_ready(temperature_scale(logits_tiny, temperature))
    ref_tiny = logits_tiny / temperature
    assert out_tiny.shape == ref_tiny.shape and out_tiny.dtype == ref_tiny.dtype
    assert jnp.allclose(out_tiny, ref_tiny, rtol=1e-5, atol=1e-6)

    # 2) Pallas path, single lane-dense block, no padding needed
    #    (512*10 = 5120 = 10 rows x 512 lanes).
    logits_mid = jax.random.normal(k2, (512, 10), dtype=jnp.float32)
    out_mid = jax.block_until_ready(temperature_scale(logits_mid, temperature))
    ref_mid = logits_mid / temperature
    assert out_mid.shape == ref_mid.shape and out_mid.dtype == ref_mid.dtype
    assert jnp.allclose(out_mid, ref_mid, rtol=1e-5, atol=1e-6)

    # 3) Pallas path with small tiles to exercise a multi-step pipelined grid
    #    (256*40 elements -> (80, 128) slab -> grid of 10 row tiles).
    logits_big = jax.random.normal(k3, (256, 40), dtype=jnp.float32)
    out_big = jax.block_until_ready(
        temperature_scale(logits_big, temperature, block_rows=8, lane=128)
    )
    ref_big = logits_big / temperature
    assert out_big.shape == ref_big.shape and out_big.dtype == ref_big.dtype
    assert jnp.allclose(out_big, ref_big, rtol=1e-5, atol=1e-6)

    # 4) Non-lane-divisible case to exercise the padded path
    #    (37*10 = 370 -> padded to one (1, 512) block).
    logits_odd = jax.random.normal(k4, (37, 10), dtype=jnp.float32)
    out_odd = jax.block_until_ready(
        temperature_scale(logits_odd, temperature, tiny_threshold=0)
    )
    ref_odd = logits_odd / temperature
    assert out_odd.shape == ref_odd.shape and out_odd.dtype == ref_odd.dtype
    assert jnp.allclose(out_odd, ref_odd, rtol=1e-5, atol=1e-6)

    print("KERNEL_OK")
</pallas_src>

<mosaic_0001>
module attributes {stable_mosaic.version = 11 : i64} {
  func.func @_temp_scale_kernel(%arg0: i32, %arg1: memref<1xf32, #tpu.memory_space<smem>>, %arg2: memref<10x512xf32, #tpu.memory_space<vmem>>, %arg3: memref<10x512xf32, #tpu.memory_space<vmem>>) attributes {dimension_semantics = [#tpu.dimension_semantics<parallel>], iteration_bounds = array<i64: 1>, scalar_prefetch = 0 : i64, scratch_operands = 0 : i64, tpu.core_type = #tpu.core_type<tc>, window_params = [{transform_indices = @transform_0, window_bounds = array<i64: 1>}, {transform_indices = @transform_1, window_bounds = array<i64: 10, 512>}, {transform_indices = @transform_2, window_bounds = array<i64: 10, 512>}]} {
    %c0 = arith.constant 0 : index
    %0 = memref.load %arg1[%c0] : memref<1xf32, #tpu.memory_space<smem>>
    %cst = arith.constant 1.000000e+00 : f32
    %1 = arith.divf %cst, %0 : f32
    %c0_0 = arith.constant 0 : index
    %c0_1 = arith.constant 0 : index
    %2 = vector.load %arg2[%c0_0, %c0_1] : memref<10x512xf32, #tpu.memory_space<vmem>>, vector<10x512xf32>
    %3 = vector.broadcast %1 : f32 to vector<10x512xf32>
    %4 = arith.mulf %2, %3 : vector<10x512xf32>
    %c0_2 = arith.constant 0 : index
    %c0_3 = arith.constant 0 : index
    %5 = vector.load %arg3[%c0_2, %c0_3] : memref<10x512xf32, #tpu.memory_space<vmem>>, vector<10x512xf32>
    tpu.vector_store %arg3[%c0_2, %c0_3], %4 {strides = array<i32>} : memref<10x512xf32, #tpu.memory_space<vmem>>, vector<10x512xf32>,
    return
  }
  func.func @transform_0(%arg0: i32) -> i32 {
    %c0_i32 = arith.constant 0 : i32
    %c0_i32_0 = arith.constant 0 : i32
    return %c0_i32 : i32
  }
  func.func @transform_1(%arg0: i32) -> (i32, i32) {
    %c0_i32 = arith.constant 0 : i32
    %c0_i32_0 = arith.constant 0 : i32
    return %arg0, %c0_i32 : i32, i32
  }
  func.func @transform_2(%arg0: i32) -> (i32, i32) {
    %c0_i32 = arith.constant 0 : i32
    %c0_i32_0 = arith.constant 0 : i32
    return %arg0, %c0_i32 : i32, i32
  }
}

</mosaic_0001>

<bundles_post_ra>
// kernel: tpu_custom_call.1
= control target key start
LH: loop header
LB: loop body
LE: loop exit
PB: predicated region body
PF: predicated region fallthrough
CT: control target
= control target key end

     0   :  { %8 = vsyncpa [#allocation4], 0  ;;  %s181_s0 = inlined_call_operand.<no memory space> [shape: f32[1], index: 0, kind: input, shape index: {}]   ;;  %s182_s1 = inlined_call_operand.hbm [shape: f32[10,512], index: 1, kind: input, shape index: {}]   ;;  %s183_s2 = inlined_call_operand.hbm [shape: f32[10,512], index: 2, kind: output, shape index: {}]  }
   0x1   :  { %9 = vsyncpa [#allocation5], 0  ;;  %s129_s9 = smov [#allocation3]   ;;  %s81_s13 = scalar_lea.hbm %s182_s1, 1024 }
   0x2   :  { %s17_s10 = sshll.u32 %s129_s9, 4  ;;  %p82_p0 = scmp.ne.s32.totalorder %s182_s1, %s81_s13  ;;  %s18_s10 = int_to_ptr.vmem [resolvable:$true] %s17_s10 }
   0x3   :  { %p85_p1 = scmp.lt.u32.totalorder %s81_s13, %s182_s1 }
   0x5   :  { %p87_p2 = pnand %p85_p1, %p82_p0 }
   0x7   :  { %90 = shalt.err (!%p87_p2)
}
   0x8   :  { %s91_s18 = scalar_lea.vmem %s18_s10, 1024  ;;  %p96_p4 = scmp.lt.s32.totalorder %s18_s10, %s18_s10 }
   0x9   :  { %p92_p3 = scmp.ne.s32.totalorder %s18_s10, %s91_s18  ;;  %p97_p5 = scmp.lt.s32.totalorder %s91_s18, %s91_s18 }
   0xb   :  { %p98_p6 = por %p97_p5, %p96_p4 }
   0xd   :  { %p99_p7 = pnand %p98_p6, %p92_p3 }
   0xf   :  { %102 = shalt.err (!%p99_p7)
}
  0x10   :  { %s130_s19 = smov 512   ;;  %s131_s20 = smov 32   ;;  %v28_v0 = vstv %s181_s0 }
  0x11   :  { %23 = dma.hbm_to_vmem [thread:$0]  %s182_s1, 1024, %s18_s10, [#allocation4], %s130_s19, %s130_s19, %s131_s20  }
  0x12   :  { %125 = dma.done.wait [#allocation4], 1024  }
  0x13   :  { %126 = vsyncadd [#allocation4], 4294966272  ;;  %79 = vrcp.f32 %v28_v0  ;;  %v31_v2 = vld [vmem:[#allocation3] sm:$0xff]  ;;  %v32_v3 = vld [vmem:[#allocation3 + $0x8] sm:$0xff]  ;;  %s132_s25 = smov [#allocation6]  }
  0x14   :  { %v33_v4 = vld [vmem:[#allocation3 + $0x10] sm:$0xff]  ;;  %v34_v5 = vld [vmem:[#allocation3 + $0x18] sm:$0xff]  ;;  %v35_v6 = vld [vmem:[#allocation3 + $0x20] sm:$0x3]  ;;  %s61_s26 = sshll.u32 %s132_s25, 4  ;;  %s62_s26 = int_to_ptr.vmem [resolvable:$true] %s61_s26 }
  0x15   :  { %v36_v7 = vld [vmem:[#allocation3 + $0x28] sm:$0x3]  ;;  %v37_v8 = vld [vmem:[#allocation3 + $0x30] sm:$0x3]  ;;  %v38_v9 = vld [vmem:[#allocation3 + $0x38] sm:$0x3]  ;;  %p108_p9 = scmp.lt.s32.totalorder %s62_s26, %s62_s26 }
  0x16   :  { %s103_s0 = scalar_lea.vmem %s62_s26, 1024 }
  0x17   :  { %p104_p8 = scmp.ne.s32.totalorder %s62_s26, %s103_s0  ;;  %p109_p10 = scmp.lt.s32.totalorder %s103_s0, %s103_s0 }
  0x19   :  { %p110_p11 = por %p109_p10, %p108_p9 }
  0x1b   :  { %p111_p12 = pnand %p110_p11, %p104_p8 }
  0x1d   :  { %v80_v1 = vpop.eup %79 }
  0x1e   :  { %73 = vpush %v80_v1 }
  0x4f   :  { %s74_s27 = spop %73 }
  0x50   :  { %v39_v10 = vstv %s74_s27 }
  0x51   :  { %v40_v11 = vmul.f32 %v39_v10, %v31_v2  ;;  %v41_v12 = vmul.f32 %v39_v10, %v32_v3  ;;  %v42_v13 = vmul.f32 %v39_v10, %v33_v4  ;;  %v43_v14 = vmul.f32 %v39_v10, %v34_v5 }
  0x52   :  { %v44_v15 = vmul.f32 %v39_v10, %v35_v6  ;;  %v45_v16 = vmul.f32 %v39_v10, %v36_v7  ;;  %v46_v17 = vmul.f32 %v39_v10, %v37_v8  ;;  %v47_v18 = vmul.f32 %v39_v10, %v38_v9 }
  0x53   :  { %48 = vst [vmem:[#allocation6] sm:$0xff] %v40_v11  ;;  %49 = vst [vmem:[#allocation6 + $0x8] sm:$0xff] %v41_v12 }
  0x54   :  { %50 = vst [vmem:[#allocation6 + $0x10] sm:$0xff] %v42_v13  ;;  %51 = vst [vmem:[#allocation6 + $0x18] sm:$0xff] %v43_v14 }
  0x55   :  { %52 = vst [vmem:[#allocation6 + $0x20] sm:$0x3] %v44_v15  ;;  %53 = vst [vmem:[#allocation6 + $0x28] sm:$0x3] %v45_v16 }
  0x56   :  { %54 = vst [vmem:[#allocation6 + $0x30] sm:$0x3] %v46_v17  ;;  %55 = vst [vmem:[#allocation6 + $0x38] sm:$0x3] %v47_v18 }
  0x57   :  { %114 = shalt.err (!%p111_p12)
}
  0x58   :  { %s115_s29 = scalar_lea.hbm %s183_s2, 1024 }
  0x59   :  { %p116_p13 = scmp.ne.s32.totalorder %s183_s2, %s115_s29  ;;  %p119_p0 = scmp.lt.u32.totalorder %s115_s29, %s183_s2 }
  0x5b   :  { %p121_p1 = pnand %p119_p0, %p116_p13 }
  0x5d   :  { %124 = shalt.err (!%p121_p1)
}
  0x5e   :  { %67 = dma.vmem_to_hbm [thread:$0]  %s62_s26, 1024, %s183_s2, [#allocation5], %s130_s19, %s130_s19, %s131_s20  }
  0x5f   :  { %127 = dma.done.wait [#allocation5], 1024  }
  0x60   :  { %128 = vsyncadd [#allocation5], 4294966272 }
  0x61   :  { %71 = vsyncpa [#allocation4], 1 }
  0x62   :  { %72 = vsyncpa [#allocation5], 1 }

</bundles_post_ra>
